<compile_context>
chip_gen: v7x
topology: tpu7x:2x2x1
jax: 0.10.0
libtpu: 0.0.40
codegen_flags: <defaults>
</compile_context>

<pallas_src>
import jax
import jax.numpy as jnp
from jax import lax
from jax.experimental import pallas as pl
from jax.experimental.pallas import tpu as pltpu


_VMEM_LIMIT_BYTES = 28 << 20    # scoped VMEM requested (fits v5e/v6e/v7x)
_BLOCK_BUDGET_BYTES = 20 << 20  # budget for pipelined block buffers


def _enc_combiner_kernel(w_ref, b_ref, x1_ref, x2_ref, o_ref):
    """out = w @ x2 + bias + x1 for one (batch-block, spatial-tile) grid step.

    w_ref:  (Cout, Cin)    weight-normalized 1x1 conv weight (resident)
    b_ref:  (Cout, 1)      bias (f32), broadcast along spatial lanes
    x1_ref: (Bb, Cout, T)  residual input tile
    x2_ref: (Bb, Cin,  T)  conv input tile
    o_ref:  (Bb, Cout, T)  output tile (lane-dense: T is a multiple of 128)
    """
    w = w_ref[...]
    b = b_ref[...]
    for i in range(o_ref.shape[0]):            # static, small Bb unroll
        conv = jnp.dot(w, x2_ref[i], preferred_element_type=jnp.float32)
        o_ref[i] = (conv + b + x1_ref[i]).astype(o_ref.dtype)


def _choose_blocks(B, HW_p, Cin, Cout, itemsize):
    """Pick (Bb, T): batch block and spatial tile (multiple of 128)."""
    # Resident weight + bias blocks (double-buffered by the pipeline too),
    # with lane padding to 128, plus ~1 MiB compiler/internal headroom.
    resident = 2 * (Cout * max(Cin, 128) + Cout * 128) * 4 + (1 << 20)
    budget = max(_BLOCK_BUDGET_BYTES - resident, 1 << 20)
    per_lane = (Cin + 2 * Cout) * itemsize * 2    # x1 + x2 + out, double-buffered
    t_max = max(128, (budget // per_lane) // 128 * 128)
    T = min(HW_p, t_max)
    while HW_p % T:
        T -= 128

    # Amortize per-grid-step overhead over batch when the whole (padded)
    # spatial extent already fits in one tile, but keep >= 2 total grid
    # steps so both v7x TensorCores get work.
    Bb = 1
    if T == HW_p:
        while (Bb * 2 <= B and B % (Bb * 2) == 0
               and (Bb * 2) * per_lane * T <= budget
               and (B // (Bb * 2)) * (HW_p // T) >= 2):
            Bb *= 2

    # B == 1 with a single spatial tile -> split the spatial axis so the grid
    # has >= 2 parallel steps (v7x megacore), when possible.
    if (B // Bb) * (HW_p // T) == 1 and HW_p > 128:
        t = (HW_p // 2) // 128 * 128
        while t >= 128 and HW_p % t:
            t -= 128
        if t >= 128:
            T = t
    return Bb, T


def enc_combiner_pallas(x1, x2, w_norm, bias, *, hw_tile=None, batch_block=None):
    """x1 + (1x1 conv(x2, w_norm) + bias). NCHW in / NCHW out."""
    B, Cout, H, W = x1.shape
    B2, Cin, H2, W2 = x2.shape
    assert B == B2 and (H, W) == (H2, W2) and w_norm.shape == (Cout, Cin)

    out_dtype = x1.dtype                 # native dtype end-to-end
    in_dtype = x2.dtype
    HW = H * W
    HW_p = pl.cdiv(HW, 128) * 128        # pad spatial extent to lane multiple

    x1f = x1.reshape(B, Cout, HW)
    x2f = x2.reshape(B, Cin, HW)
    if HW_p != HW:
        pad = ((0, 0), (0, 0), (0, HW_p - HW))
        x1f = jnp.pad(x1f, pad)
        x2f = jnp.pad(x2f, pad)

    w = w_norm.astype(in_dtype)                       # matmul operand dtype
    b = bias.reshape(Cout, 1).astype(jnp.float32)     # tiny; keep f32

    itemsize = max(jnp.dtype(out_dtype).itemsize, jnp.dtype(in_dtype).itemsize)
    Bb, T = _choose_blocks(B, HW_p, Cin, Cout, itemsize)
    if batch_block is not None:
        Bb = batch_block
    if hw_tile is not None:
        T = hw_tile
    assert B % Bb == 0, "batch_block must divide the batch size"
    assert HW_p % T == 0 and (T % 128 == 0 or T == HW_p), (
        "hw_tile must divide the padded spatial extent and be a multiple of 128")

    out = pl.pallas_call(
        _enc_combiner_kernel,
        out_shape=jax.ShapeDtypeStruct((B, Cout, HW_p), out_dtype),
        grid_spec=pltpu.PrefetchScalarGridSpec(
            num_scalar_prefetch=0,
            grid=(B // Bb, HW_p // T),
            in_specs=[
                pl.BlockSpec((Cout, Cin), lambda bi, ti: (0, 0)),
                pl.BlockSpec((Cout, 1), lambda bi, ti: (0, 0)),
                pl.BlockSpec((Bb, Cout, T), lambda bi, ti: (bi, 0, ti)),
                pl.BlockSpec((Bb, Cin, T), lambda bi, ti: (bi, 0, ti)),
            ],
            out_specs=pl.BlockSpec((Bb, Cout, T), lambda bi, ti: (bi, 0, ti)),
        ),
        compiler_params=pltpu.CompilerParams(
            dimension_semantics=("parallel", "parallel"),
            vmem_limit_bytes=_VMEM_LIMIT_BYTES),
        # Residual input and output share shape & dtype -> reuse the buffer.
        input_output_aliases={2: 0},
    )(w, b, x1f, x2f)

    if HW_p != HW:
        out = out[:, :, :HW]
    return out.reshape(B, Cout, H, W)


def _normalize_weight(weight, log_weight_norm):
    """normalize_weight_jit from the PyTorch module (tiny -> done in XLA)."""
    Cout, Cin = weight.shape[0], weight.shape[1]
    wf = weight.astype(jnp.float32)
    n = jnp.exp(log_weight_norm.reshape(Cout).astype(jnp.float32))
    wn = jnp.sqrt(jnp.sum(wf * wf, axis=(1, 2, 3)))
    scale = n / (wn + 1e-5)
    return scale.reshape(Cout, 1) * wf.reshape(Cout, Cin)


def enc_combiner_forward(x1, x2, weight, bias, log_weight_norm, *,
                         hw_tile=None, batch_block=None):
    """EncCombinerCell.forward: x1 + Conv2D(x2) (weight norm + bias).

    data_init defaults to False for this cell's Conv2D, so there is no
    data-dependent init pass.
    # TODO(synk): torch.distributed average_tensor only appears in the
    # data_init branch, which this cell never takes.
    """
    w_norm = _normalize_weight(weight, log_weight_norm)
    return enc_combiner_pallas(x1, x2, w_norm, bias,
                               hw_tile=hw_tile, batch_block=batch_block)


def enc_combiner_forward_ref(x1, x2, weight, bias, log_weight_norm):
    """Pure-JAX (XLA) reference for correctness checking."""
    Cout = weight.shape[0]
    w_norm = _normalize_weight(weight, log_weight_norm)
    conv = jnp.einsum('oc,bchw->bohw', w_norm, x2.astype(jnp.float32),
                      precision=lax.Precision.HIGHEST)
    return x1.astype(jnp.float32) + conv + bias.reshape(1, Cout, 1, 1)


if __name__ == "__main__":
    # EncCombinerCell(Cin1=8, Cin2=4, Cout=8, cell_type='combiner_enc')
    B, Cin2, Cout, H, W = 2, 4, 8, 16, 16

    key = jax.random.PRNGKey(0)
    k1, k2, kw, kb = jax.random.split(key, 4)
    x1 = jax.random.normal(k1, (B, Cout, H, W), jnp.float32)
    x2 = jax.random.normal(k2, (B, Cin2, H, W), jnp.float32)
    weight = jax.random.normal(kw, (Cout, Cin2, 1, 1), jnp.float32) * 0.1
    bias = jax.random.normal(kb, (Cout,), jnp.float32) * 0.1
    # Conv2D.__init__: log_weight_norm = log(norm(weight, dim=[1,2,3]) + 0.01)
    log_weight_norm = jnp.log(
        jnp.sqrt(jnp.sum(weight * weight, axis=(1, 2, 3))) + 0.01
    ).reshape(Cout, 1, 1, 1)

    out = enc_combiner_forward(x1, x2, weight, bias, log_weight_norm)
    out = jax.block_until_ready(out)

    ref = enc_combiner_forward_ref(x1, x2, weight, bias, log_weight_norm)
    assert out.shape == (B, Cout, H, W), out.shape
    assert jnp.allclose(out.astype(jnp.float32), ref, atol=1e-4, rtol=1e-4), \
        float(jnp.max(jnp.abs(out.astype(jnp.float32) - ref)))

    print("KERNEL_OK")
</pallas_src>

<mosaic_0001>
module attributes {stable_mosaic.version = 11 : i64} {
  func.func @_enc_combiner_kernel(%arg0: i32, %arg1: i32, %arg2: memref<8x4xf32, #tpu.memory_space<vmem>>, %arg3: memref<8x1xf32, #tpu.memory_space<vmem>>, %arg4: memref<1x8x256xf32, #tpu.memory_space<vmem>>, %arg5: memref<1x4x256xf32, #tpu.memory_space<vmem>>, %arg6: memref<1x8x256xf32, #tpu.memory_space<vmem>>) attributes {dimension_semantics = [#tpu.dimension_semantics<parallel>, #tpu.dimension_semantics<parallel>], iteration_bounds = array<i64: 2, 1>, scalar_prefetch = 0 : i64, scratch_operands = 0 : i64, tpu.core_type = #tpu.core_type<tc>, window_params = [{pipeline_mode = #tpu.pipeline_mode<synchronous>, transform_indices = @transform_0, window_bounds = array<i64: 8, 4>}, {pipeline_mode = #tpu.pipeline_mode<synchronous>, transform_indices = @transform_1, window_bounds = array<i64: 8, 1>}, {transform_indices = @transform_2, window_bounds = array<i64: 1, 8, 256>}, {transform_indices = @transform_3, window_bounds = array<i64: 1, 4, 256>}, {transform_indices = @transform_4, window_bounds = array<i64: 1, 8, 256>}]} {
    %c0 = arith.constant 0 : index
    %c0_0 = arith.constant 0 : index
    %0 = vector.load %arg2[%c0, %c0_0] : memref<8x4xf32, #tpu.memory_space<vmem>>, vector<8x4xf32>
    %c0_1 = arith.constant 0 : index
    %c0_2 = arith.constant 0 : index
    %1 = vector.load %arg3[%c0_1, %c0_2] : memref<8x1xf32, #tpu.memory_space<vmem>>, vector<8x1xf32>
    %c0_3 = arith.constant 0 : index
    %c0_4 = arith.constant 0 : index
    %c0_5 = arith.constant 0 : index
    %2 = vector.load %arg5[%c0_3, %c0_4, %c0_5] : memref<1x4x256xf32, #tpu.memory_space<vmem>>, vector<1x4x256xf32>
    %3 = vector.shape_cast %2 : vector<1x4x256xf32> to vector<4x256xf32>
    %cst = arith.constant dense<0.000000e+00> : vector<8x256xf32>
    %4 = tpu.matmul %0, %3, %cst {dimension_numbers = #tpu.dot_dimension_numbers<[1], [0], [0], [1], [0, 0, 1, 1], [], []>} : vector<8x4xf32>, vector<4x256xf32>, vector<8x256xf32> -> vector<8x256xf32>
    %5 = vector.broadcast %1 : vector<8x1xf32> to vector<8x256xf32>
    %6 = arith.addf %4, %5 : vector<8x256xf32>
    %c0_6 = arith.constant 0 : index
    %c0_7 = arith.constant 0 : index
    %c0_8 = arith.constant 0 : index
    %7 = vector.load %arg4[%c0_6, %c0_7, %c0_8] : memref<1x8x256xf32, #tpu.memory_space<vmem>>, vector<1x8x256xf32>
    %8 = vector.shape_cast %7 : vector<1x8x256xf32> to vector<8x256xf32>
    %9 = arith.addf %6, %8 : vector<8x256xf32>
    %c0_9 = arith.constant 0 : index
    %c0_10 = arith.constant 0 : index
    %c0_11 = arith.constant 0 : index
    %10 = vector.load %arg6[%c0_9, %c0_10, %c0_11] : memref<1x8x256xf32, #tpu.memory_space<vmem>>, vector<1x8x256xf32>
    %11 = vector.shape_cast %10 : vector<1x8x256xf32> to vector<8x256xf32>
    %12 = vector.shape_cast %9 : vector<8x256xf32> to vector<1x8x256xf32>
    tpu.vector_store %arg6[%c0_9, %c0_10, %c0_11], %12 {strides = array<i32>} : memref<1x8x256xf32, #tpu.memory_space<vmem>>, vector<1x8x256xf32>,
    return
  }
  func.func @transform_0(%arg0: i32, %arg1: i32) -> (i32, i32) {
    %c0_i32 = arith.constant 0 : i32
    %c0_i32_0 = arith.constant 0 : i32
    %c0_i32_1 = arith.constant 0 : i32
    return %c0_i32, %c0_i32_0 : i32, i32
  }
  func.func @transform_1(%arg0: i32, %arg1: i32) -> (i32, i32) {
    %c0_i32 = arith.constant 0 : i32
    %c0_i32_0 = arith.constant 0 : i32
    %c0_i32_1 = arith.constant 0 : i32
    return %c0_i32, %c0_i32_0 : i32, i32
  }
  func.func @transform_2(%arg0: i32, %arg1: i32) -> (i32, i32, i32) {
    %c0_i32 = arith.constant 0 : i32
    %c0_i32_0 = arith.constant 0 : i32
    return %arg0, %c0_i32, %arg1 : i32, i32, i32
  }
  func.func @transform_3(%arg0: i32, %arg1: i32) -> (i32, i32, i32) {
    %c0_i32 = arith.constant 0 : i32
    %c0_i32_0 = arith.constant 0 : i32
    return %arg0, %c0_i32, %arg1 : i32, i32, i32
  }
  func.func @transform_4(%arg0: i32, %arg1: i32) -> (i32, i32, i32) {
    %c0_i32 = arith.constant 0 : i32
    %c0_i32_0 = arith.constant 0 : i32
    return %arg0, %c0_i32, %arg1 : i32, i32, i32
  }
}

</mosaic_0001>

<bundles_post_ra>
// kernel: tpu_custom_call.1
= control target key start
LH: loop header
LB: loop body
LE: loop exit
PB: predicated region body
PF: predicated region fallthrough
CT: control target
= control target key end

     0   :  { %9 = vsyncpa [#allocation3], 0  ;;  %s904_s0 = inlined_call_operand.vmem [shape: f32[8,4], index: 0, kind: input, shape index: {}]   ;;  %s905_s1 = inlined_call_operand.vmem [shape: f32[8,1], index: 1, kind: input, shape index: {}]   ;;  %s906_s2 = inlined_call_operand.hbm [shape: f32[2,8,256], index: 2, kind: input, shape index: {}, may-alias: {2,4}]   ;;  %s907_s3 = inlined_call_operand.vmem [shape: f32[2,4,256], index: 3, kind: input, shape index: {}]   ;;  %s908_s4 = inlined_call_operand.hbm [shape: f32[2,8,256], index: 4, kind: output, shape index: {}, may-alias: {2,4}]  }
   0x1   :  { %11 = vsyncpa [#allocation3 + $0x1], 0 }
   0x2   :  { %12 = vsyncpa [#allocation4], 0 }
   0x3   :  { %14 = vsyncpa [#allocation4 + $0x1], 0  ;;  %s717_s15 = smov 0   ;;  %s719_s16 = smov 0  }
   0x4   :  { %s721_s17 = smov 0   ;;  %s723_s18 = smov 0  }
   0x5   :  { %s725_s19 = smov 0   ;;  %s727_s20 = smov 0  }
   0x6 LB: > { %s485_s21 = sadd.s32 4294967295, %s686_s20   ;;  %s486_s22 = sadd.s32 4294967294, %s686_s20   ;;  %s686_s20 = sphi %s727_s20, %s20_s20   ;;  %s682_s19 = sphi %s725_s19, %s924_s19   ;;  %s678_s18 = sphi %s723_s18, %s923_s18   ;;  %s674_s17 = sphi %s721_s17, %s922_s17   ;;  %s670_s16 = sphi %s719_s16, %s921_s16   ;;  %s666_s15 = sphi %s717_s15, %s920_s15  }
   0x7   : > { %s32_s23 = sadd.s32 1, %s682_s19  ;;  %s83_s24 = sadd.s32 1, %s674_s17 }
   0x8   : > { %p34_p0 = scmp.ge.s32.totalorder %s32_s23, 2  ;;  %p90_p1 = scmp.ne.s32.totalorder %s674_s17, %s670_s16 }
   0x9   : > { %p91_p2 = scmp.eq.s32.totalorder %s686_s20, 0  ;;  %p96_p3 = scmp.ne.s32.totalorder %s670_s16, %s666_s15 }
   0xa   : > { %s926_s23 = smov (%p34_p0, %s32_s23), 0  ;;  %p97_p5 = scmp.eq.s32.totalorder %s485_s21, 0 }
   0xb   : > { %p758_p4 = por %p91_p2, %p90_p1  ;;  %s78_s26 = ssub.s32 %s682_s19, %s926_s23 }
   0xc   : > { %p150_p6 = scmp.eq.s32.totalorder %s485_s21, 1  ;;  %p81_p7 = scmp.eq.s32.totalorder %s78_s26, 0 }
   0xd   : > { %p764_p8 = por %p97_p5, %p96_p3  ;;  %p156_p10 = scmp.eq.s32.totalorder %s486_s22, 1 }
   0xe   : > { %p768_p9 = por %p150_p6, %p90_p1  ;;  %p520_p13 = scmp.lt.s32.totalorder %s686_s20, 2 }
   0xf   : > { %s773_s29 = scalar_select %p81_p7, %s674_s17, %s83_s24  }
  0x10   : > { %s912_s28 = scalar_select %p768_p9, 1, 0 }
  0x11   : > { %p775_p11 = por %p156_p10, %p96_p3  ;;  %s182_s5 = sand.u32 1, %s674_s17  }
  0x12   : > { %s489_s6 = sshll.u32 %s182_s5, 4  ;;  %s505_s7 = sshll.u32 %s682_s19, 8 }
  0x13   : > { %s913_s30 = scalar_select %p775_p11, 1, 0 }
  0x14   : > { %s786_s10 = scalar_lea.hbm %s906_s2, %s505_s7  ;;  %s186_s11 = scalar_lea.vmem [#allocation2], %s489_s6 }
  0x15   : > { %s196_s12 = sshll.u32 %s186_s11, 4  ;;  %p792_p0 = pnand %p520_p13, %p758_p4  ;;  %s788_s12 = int_to_ptr.vmem [resolvable:$true] %s196_s12 }
  0x16   : > { %s183_s14 = scalar_lea.sflag [#allocation3], %s182_s5  ;;  %s574_s21 = scalar_lea.hbm %s786_s10, 256 }
  0x17   : > { %p575_p3 = scmp.ne.s32.totalorder %s786_s10, %s574_s21  ;;  %p576_p5 = pneg %p792_p0 }
  0x18   : > { %s579_s25 = scalar_lea.hbm %s906_s2, 512  ;;  %p580_p4 = scmp.lt.u32.totalorder %s786_s10, %s906_s2 }
  0x19   : > { %p577_p6 = pnand %p576_p5, %p575_p3  ;;  %p581_p10 = scmp.lt.u32.totalorder %s579_s25, %s574_s21 }
  0x1a   : > { %p583_p12 = scmp.lt.u32.totalorder %s574_s21, %s786_s10 }
  0x1b   : > { %p578_p7 = pneg %p577_p6  ;;  %p582_p13 = por %p581_p10, %p580_p4 }
  0x1d   : > { %p584_p1 = por %p583_p12, %p582_p13 }
  0x1f   : > { %p585_p2 = pnand %p584_p1, %p578_p7 }
  0x21   : > { %588 = shalt.err (!%p585_p2)
}
  0x22   : > { %s589_s5 = scalar_lea.vmem %s788_s12, 256  ;;  %s688_s7 = smov [#allocation2]  }
  0x23   : > { %p590_p3 = scmp.ne.s32.totalorder %s788_s12, %s589_s5  ;;  %s594_s8 = sshll.u32 %s688_s7, 4  ;;  %s595_s8 = int_to_ptr.vmem [resolvable:$false] %s594_s8 }
  0x24   : > { %s596_s9 = scalar_lea.vmem %s595_s8, 512  ;;  %p597_p9 = scmp.lt.s32.totalorder %s788_s12, %s595_s8 }
  0x25   : > { %p592_p6 = pnand %p590_p3, %p576_p5  ;;  %p598_p4 = scmp.lt.s32.totalorder %s596_s9, %s589_s5 }
  0x27   : > { %p593_p11 = pneg %p592_p6  ;;  %p599_p10 = por %p598_p4, %p597_p9 }
  0x29   : > { %p600_p12 = pnand %p599_p10, %p593_p11 }
  0x2b   : > { %603 = shalt.err (!%p600_p12)
}
  0x2c   : > { %515 = dma.hbm_to_vmem [thread:$0]  (!%p792_p0), %s786_s10, 256, %s788_s12, %s183_s14  }
  0x2d   : > { %p915_p1 = scmp.lt.s32.totalorder %s686_s20, 3  ;;  %p916_p2 = scmp.ge.s32.totalorder %s686_s20, 1 }
  0x2f   : > { %p215_p5 = pnand %p916_p2, %p915_p1 }
  0x30   : > { %s828_s11 = sand.u32 (!%p215_p5), 1, %s670_s16  }
  0x31   : > { %218 = sbr.rel (%p215_p5) target bundleno = 299 (0x12b), region = 36  ;;  %s493_s21 = sshll.u32 (!%p215_p5), %s828_s11, 4 }
  0x32   : > { %s221_s22 = scalar_lea.sflag (!%p215_p5), [#allocation3], %s828_s11  ;;  %s224_s13 = scalar_lea.vmem (!%p215_p5), [#allocation2], %s493_s21 }
  0x38   : > { %657 = dma.done.wait (%p764_p8), %s221_s22, 256  }
  0x39   : > { %659 = vsyncadd (%p764_p8), %s221_s22, 4294967040  ;;  %p260_p9 = scmp.lt.s32.totalorder %s678_s18, 1  ;;  %v689_v0 = vmov 0.0   ;;  %v690_v1 = vmov 0   ;;  %vm284_vm0 = vcmask 1043456   ;;  %v271_v3 = vld [vmem:[%s905_s1] sm:$0xff] }
  0x3a   : > { %353 = vmatprep.mubr.f32.mxu0 %v689_v0  ;;  %572 = vset.pattern.permute.xlu0 %v690_v1  ;;  %v270_v5 = vld [vmem:[%s904_s0] sm:$0xff]  ;;  %vm280_vm1 = vcmask 31744   ;;  %v361_v11 = vld [vmem:[%s224_s13 + $0x8] sm:$0xff]  ;;  %s507_s7 = sshll.u32 %s678_s18, 8  ;;  %s257_s8 = scalar_lea.vmem [#allocation5], %s493_s21 }
  0x3b   : > { %s261_s10 = scalar_select %p260_p9, %s678_s18, 1  ;;  %275 = vperm.xlu0 %572, %v271_v3   ;;  %v360_v8 = vld [vmem:[%s224_s13] sm:$0xff] }
  0x3c   : > { %s383_s9 = sshll.u32 %s257_s8, 4  ;;  %s367_s13 = scalar_lea.sflag [#allocation4], %s828_s11  ;;  %s857_s9 = int_to_ptr.vmem [resolvable:$true] %s383_s9 }
  0x3d   : > { %s506_s12 = sshll.u32 %s261_s10, 3  ;;  %s604_s18 = scalar_lea.vmem %s857_s9, 256 }
  0x3e   : > { %s267_s25 = scalar_lea.vmem %s907_s3, %s506_s12  ;;  %s855_s12 = scalar_lea.hbm %s908_s4, %s507_s7 }
  0x3f   : > { %v272_v2 = vld [vmem:[%s267_s25] sm:$0xff]  ;;  %p605_p8 = scmp.ne.s32.totalorder %s857_s9, %s604_s18  ;;  %p917_p11 = scmp.ne.s32.totalorder %s912_s28, 0 }
  0x40   : > { %v279_v4 = vcombine.high %v272_v2, %v272_v2  ;;  %s691_s21 = smov [#allocation5]  }
  0x41   : > { %p606_p0 = pnand %p605_p8, %p917_p11  ;;  %s608_s14 = sshll.u32 %s691_s21, 4  ;;  %s609_s14 = int_to_ptr.vmem [resolvable:$false] %s608_s14 }
  0x42   : > { %497 = vmatprep.subr.msk.mxu0 %vm284_vm0, %v279_v4  ;;  %s610_s24 = scalar_lea.vmem %s609_s14, 512  ;;  %p611_p13 = scmp.lt.s32.totalorder %s857_s9, %s609_s14 }
  0x43   : > { %498 = vmatpush1.msk.msra.mxu0 %vm284_vm0, %v272_v2  ;;  %p607_p7 = pneg %p606_p0  ;;  %p612_p3 = scmp.lt.s32.totalorder %s610_s24, %s604_s18 }
  0x44   : > { %499 = vmatmul.mubr.msk.f32.vlgmr.msra.gmra.mrb[0].mxu0 %vm280_vm1, %v270_v5 }
  0x45   : > { %p613_p6 = por %p612_p3, %p611_p13 }
  0x47   : > { %p614_p4 = pnand %p613_p6, %p607_p7 }
  0xba   : > { %v276_v6 = vpop.permute.xlu0 %275 }
 0x117   : > { %v355_v7 = vpop.f32.mrb[0].mxu0 }
 0x118   : > { %v356_v9 = vadd.f32 %v355_v7, %v276_v6  ;;  %v357_v10 = vpop.f32.mrb[1].mxu0 }
 0x119   : > { %v358_v12 = vadd.f32 %v357_v10, %v276_v6 }
 0x11a   : > { %v362_v13 = vadd.f32 %v360_v8, %v356_v9 }
 0x11b   : > { %v363_v14 = vadd.f32 %v361_v11, %v358_v12 }
 0x11c   : > { %364 = vst [vmem:[%s257_s8] sm:$0xff] %v362_v13 }
 0x11d   : > { %365 = vst [vmem:[%s257_s8 + $0x8] sm:$0xff] %v363_v14 }
 0x11e   : > { %617 = shalt.err (!%p614_p4)
}
 0x11f   : > { %s618_s11 = scalar_lea.hbm %s855_s12, 256  ;;  %s622_s6 = scalar_lea.hbm %s908_s4, 512 }
 0x120   : > { %p619_p10 = scmp.ne.s32.totalorder %s855_s12, %s618_s11  ;;  %p623_p2 = scmp.lt.u32.totalorder %s855_s12, %s908_s4 }
 0x121   : > { %p624_p5 = scmp.lt.u32.totalorder %s622_s6, %s618_s11  ;;  %p626_p8 = scmp.lt.u32.totalorder %s618_s11, %s855_s12 }
 0x122   : > { %p620_p12 = pnand %p619_p10, %p917_p11 }
 0x123   : > { %p625_p9 = por %p624_p5, %p623_p2 }
 0x124   : > { %p621_p1 = pneg %p620_p12 }
 0x125   : > { %p627_p0 = por %p626_p8, %p625_p9 }
 0x127   : > { %p628_p7 = pnand %p627_p0, %p621_p1 }
 0x129   : > { %631 = shalt.err (!%p628_p7)
}
 0x12a   : > { %510 = dma.vmem_to_hbm [thread:$0]  (%p917_p11), %s857_s9, 256, %s855_s12, %s367_s13  }
 0x12b PF: > { %s395_s7 = sand.u32 1, %s666_s15   ;;  %p918_p13 = scmp.ne.s32.totalorder %s913_s30, 0 }
 0x12c   : > { %p919_p3 = scmp.ge.s32.totalorder %s686_s20, 2  ;;  %s396_s8 = scalar_lea.sflag [#allocation4], %s395_s7 }
 0x12e   : > { %p517_p6 = pnand %p919_p3, %p918_p13 }
 0x130   : > { %661 = dma.done.wait (!%p517_p6), %s396_s8, 256  }
 0x131   : > { %663 = vsyncadd (!%p517_p6), %s396_s8, 4294967040  ;;  %s20_s20 = sadd.s32 1, %s686_s20   ;;  %s920_s15 = smov %s670_s16 }
 0x132   : > { %p17_p4 = scmp.ge.s32.totalorder %s20_s20, 4   ;;  %s921_s16 = smov %s674_s17 }
 0x133   : > { %s922_s17 = smov %s773_s29  ;;  %s923_s18 = smov %s682_s19 }
 0x134   : > { %s924_s19 = smov %s926_s23  ;;  %19 = sbr.rel (!%p17_p4) target bundleno = 6 (0x6), region = 84 }
 0x13b   :  { %401 = vsyncpa [#allocation3], 1 }
 0x13c   :  { %403 = vsyncpa [#allocation3 + $0x1], 1 }
 0x13d   :  { %404 = vsyncpa [#allocation4], 1 }
 0x13e   :  { %406 = vsyncpa [#allocation4 + $0x1], 1 }

</bundles_post_ra>
